<compile_context>
chip_gen: v7x
topology: tpu7x:2x2x1
jax: 0.10.0
libtpu: 0.0.40
codegen_flags: <defaults>
</compile_context>

<pallas_src>
import functools

import jax
import jax.numpy as jnp
from jax.experimental import pallas as pl
from jax.experimental.pallas import tpu as pltpu


def _row_softmax(x):
    """Row-wise softmax along the lane (last) dim in f32; EUP reciprocal + Newton."""
    x = x - jnp.max(x, axis=-1, keepdims=True)
    e = jnp.exp(x)
    s = jnp.sum(e, axis=-1, keepdims=True)
    inv = pl.reciprocal(s, approx=True)       # EUP vrcp (free slot)
    inv = inv * (2.0 - s * inv)               # one Newton step -> ~f32-exact
    return e * inv


def _mxu_dot(a, b):
    # bf16 operands hit the native bf16 MXU path; f32 operands request full precision
    # so results match an f32 reference.
    prec = jax.lax.Precision.HIGHEST if a.dtype == jnp.float32 else None
    return jnp.dot(a, b, preferred_element_type=jnp.float32, precision=prec)


def _dgs_per_sim_kernel(alpha_ref, det_ref, trk_ref, out_ref, *,
                        num_sims, similarity_softmax, combined_softmax):
    """Per-module-softmax path.

    alpha_ref: SMEM (S,) f32          det_ref: VMEM (S, TILE_D, E) input dtype
    trk_ref:   VMEM (S, E, T)         out_ref: VMEM (TILE_D, T) f32
    """
    combined = None
    for s in range(num_sims):                        # S is tiny & static -> unrolled
        sim = _mxu_dot(det_ref[s], trk_ref[s])       # (TILE_D, T), f32 accumulation
        if similarity_softmax:                       # nn.Softmax(dim=-1) per module
            sim = _row_softmax(sim)
        term = alpha_ref[s] * sim                    # StaticAlphaCombine
        combined = term if combined is None else combined + term
    if combined_softmax:                             # nn.Softmax(dim=-1) on combined
        combined = _row_softmax(combined)
    out_ref[...] = combined.astype(out_ref.dtype)


def _dgs_fused_kernel(alpha_ref, det_ref, trk_ref, out_ref, *,
                      num_sims, emb_dim, combined_softmax):
    """similarity_softmax=False path:
    sum_s a_s * (det_s @ trk_s) == det_cat_E @ [a_s * trk_s]_cat_E  -> one MXU matmul.

    alpha_ref: SMEM (S,) f32          det_ref: VMEM (TILE_D, S*E) input dtype
    trk_ref:   VMEM (S*E, T)          out_ref: VMEM (TILE_D, T) f32
    """
    trk = trk_ref[...]
    parts = []
    for s in range(num_sims):
        blk = trk[s * emb_dim:(s + 1) * emb_dim, :]
        # Fold alpha into the (small, resident) track operand inside the kernel.
        parts.append((blk.astype(jnp.float32) * alpha_ref[s]).astype(trk.dtype))
    trk_scaled = jnp.concatenate(parts, axis=0)      # (S*E, T)
    combined = _mxu_dot(det_ref[...], trk_scaled)    # single matmul, K = S*E
    if combined_softmax:
        combined = _row_softmax(combined)
    out_ref[...] = combined.astype(out_ref.dtype)


_VMEM_BUDGET = 40 * 1024 * 1024   # conservative: leaves headroom on v7x's 64 MiB VMEM


def _choose_tile_d(D, S, E, T, itemsize):
    """Largest detection tile (multiple of 8) whose double-buffered blocks fit VMEM."""
    if D <= 256:
        return D

    def fits(t):
        det = 2 * S * t * E * itemsize      # double-buffered det blocks
        out = 2 * t * T * 4                 # double-buffered f32 output blocks
        trk = 2 * S * E * T * itemsize      # resident track embeddings
        return det + out + trk + (2 << 20) <= _VMEM_BUDGET

    td = 256
    while td * 2 <= D and fits(td * 2):
        td *= 2
    while td > 8 and not fits(td):
        td //= 2
    return td


def dgs_forward(det_emb, trk_emb, alpha, *,
                similarity_softmax=False, combined_softmax=False,
                tile_d=None, out_dtype=jnp.float32):
    """Pallas implementation of DGSModule.forward.

    det_emb: (S, D, E) per-module detection embeddings
    trk_emb: (S, T, E) per-module track embeddings
    alpha:   (S,)      StaticAlphaCombine weights
    returns: (D, T+1)  combined similarity matrix with appended new-track column.
    """
    # TODO(synk): the actual SimilarityModules / Combine module are chosen by the
    # runtime config registry; dot-product similarity + static-alpha combine is the
    # representative hot path implemented here.
    S, D, E = det_emb.shape
    S2, T, E2 = trk_emb.shape
    assert S == S2 and E == E2 and alpha.shape == (S,)

    alpha = alpha.astype(jnp.float32)
    itemsize = jnp.dtype(det_emb.dtype).itemsize

    if tile_d is None:
        tile_d = _choose_tile_d(D, S, E, T, itemsize)
    if tile_d < D:
        assert tile_d % 8 == 0, "tile_d must be a multiple of 8 when tiling D"
    n_tiles = -(-D // tile_d)
    d_pad = n_tiles * tile_d

    # Pre-transpose track embeddings to (S, E, T): plain (D,E)@(E,T) in-kernel.
    trk_t = jnp.swapaxes(trk_emb, 1, 2)

    if d_pad != D:
        det_emb = jnp.pad(det_emb, ((0, 0), (0, d_pad - D), (0, 0)))

    flops = 2 * S * d_pad * E * T
    transcendentals = ((S * d_pad * T) if similarity_softmax else 0) \
                    + ((d_pad * T) if combined_softmax else 0)
    bytes_accessed = det_emb.size * itemsize + trk_t.size * itemsize + d_pad * T * 4 + S * 4
    cost = pl.CostEstimate(flops=flops, transcendentals=transcendentals,
                           bytes_accessed=bytes_accessed)

    # Raise the scoped VMEM limit only if the double-buffered working set needs it
    # (cap at 64 MiB so the same setting is safe on v5e/v6e/v7x).
    vmem_needed = (2 * S * tile_d * E * itemsize + 2 * S * E * T * itemsize
                   + 2 * tile_d * T * 4 + (2 << 20))
    cp_kwargs = dict(dimension_semantics=("parallel",))
    if vmem_needed > (32 << 20):
        cp_kwargs["vmem_limit_bytes"] = int(min(vmem_needed, 64 << 20))
    compiler_params = pltpu.CompilerParams(**cp_kwargs)

    out_shape = jax.ShapeDtypeStruct((d_pad, T), jnp.float32)
    out_spec = pl.BlockSpec((tile_d, T), lambda i: (i, 0))
    alpha_spec = pl.BlockSpec(memory_space=pltpu.MemorySpace.SMEM)

    if similarity_softmax:
        kernel = functools.partial(
            _dgs_per_sim_kernel, num_sims=S,
            similarity_softmax=True, combined_softmax=combined_softmax)
        combined = pl.pallas_call(
            kernel,
            out_shape=out_shape,
            grid=(n_tiles,),
            in_specs=[
                alpha_spec,                                         # (S,) scalars in SMEM
                pl.BlockSpec((S, tile_d, E), lambda i: (0, i, 0)),  # det: D-tiled
                pl.BlockSpec((S, E, T), lambda i: (0, 0, 0)),       # trk: resident
            ],
            out_specs=out_spec,
            compiler_params=compiler_params,
            cost_estimate=cost,
        )(alpha, det_emb, trk_t)
    else:
        # Fused single-matmul layout: det (D, S*E), trk (S*E, T).
        det_flat = jnp.transpose(det_emb, (1, 0, 2)).reshape(d_pad, S * E)
        trk_flat = trk_t.reshape(S * E, T)
        kernel = functools.partial(
            _dgs_fused_kernel, num_sims=S, emb_dim=E,
            combined_softmax=combined_softmax)
        combined = pl.pallas_call(
            kernel,
            out_shape=out_shape,
            grid=(n_tiles,),
            in_specs=[
                alpha_spec,
                pl.BlockSpec((tile_d, S * E), lambda i: (i, 0)),    # det: D-tiled
                pl.BlockSpec((S * E, T), lambda i: (0, 0)),         # trk: resident
            ],
            out_specs=out_spec,
            compiler_params=compiler_params,
            cost_estimate=cost,
        )(alpha, det_flat, trk_flat)

    combined = combined[:D]
    # torch.cat([combined, zeros((nof_det, 1))], dim=-1) — appended lane-dense in the
    # wrapper so the kernel's output stays a clean (D, T) slab.
    new_track = jnp.zeros((D, 1), dtype=combined.dtype)
    return jnp.concatenate([combined, new_track], axis=-1).astype(out_dtype)


def _reference(det_emb, trk_emb, alpha, similarity_softmax, combined_softmax):
    """Pure-JAX reference mirroring the PyTorch forward (f32 math)."""
    det = det_emb.astype(jnp.float32)
    trk = trk_emb.astype(jnp.float32)
    sims = jnp.einsum("sde,ste->sdt", det, trk, precision=jax.lax.Precision.HIGHEST)
    if similarity_softmax:
        sims = jax.nn.softmax(sims, axis=-1)
    combined = jnp.einsum("s,sdt->dt", alpha.astype(jnp.float32), sims)
    if combined_softmax:
        combined = jax.nn.softmax(combined, axis=-1)
    D = det_emb.shape[1]
    return jnp.concatenate([combined, jnp.zeros((D, 1), combined.dtype)], axis=-1)


if __name__ == "__main__":
    key = jax.random.PRNGKey(0)

    def run_case(idx, S, D, T, E, dtype, similarity_softmax, combined_softmax,
                 tile_d=None, atol=2e-3, rtol=2e-3):
        k = jax.random.fold_in(key, idx)
        k_det, k_trk = jax.random.split(k)
        det = jax.random.normal(k_det, (S, D, E), dtype=jnp.float32).astype(dtype)
        trk = jax.random.normal(k_trk, (S, T, E), dtype=jnp.float32).astype(dtype)
        # Deterministic StaticAlphaCombine weights (sum to 1).
        alpha = jnp.array([0.7, 0.3] if S == 2 else [1.0 / S] * S, dtype=jnp.float32)

        out = dgs_forward(det, trk, alpha,
                          similarity_softmax=similarity_softmax,
                          combined_softmax=combined_softmax,
                          tile_d=tile_d)
        out = jax.block_until_ready(out)

        ref = _reference(det, trk, alpha, similarity_softmax, combined_softmax)
        assert out.shape == (D, T + 1), (idx, out.shape)
        err = jnp.max(jnp.abs(out - ref))
        assert jnp.allclose(out, ref, atol=atol, rtol=rtol), \
            f"case {idx}: max abs err = {err}"

    # 1) Per-module softmax path, bf16 embeddings straight into the MXU.
    run_case(0, S=2, D=8, T=16, E=32, dtype=jnp.bfloat16,
             similarity_softmax=True, combined_softmax=True)
    # 2) PyTorch defaults (both softmaxes off) -> fused single-matmul path, f32 inputs.
    run_case(1, S=2, D=8, T=16, E=32, dtype=jnp.float32,
             similarity_softmax=False, combined_softmax=False,
             atol=5e-3, rtol=5e-3)
    # 3) D-tiled grid (2 parallel detection tiles) at slightly larger tracker shapes.
    run_case(2, S=2, D=256, T=128, E=64, dtype=jnp.bfloat16,
             similarity_softmax=True, combined_softmax=True, tile_d=128)

    print("KERNEL_OK")
</pallas_src>

<mosaic_0001>
module attributes {stable_mosaic.version = 11 : i64} {
  func.func @_dgs_per_sim_kernel(%arg0: i32, %arg1: memref<2xf32, #tpu.memory_space<smem>>, %arg2: memref<2x8x32xbf16, #tpu.memory_space<vmem>>, %arg3: memref<2x32x16xbf16, #tpu.memory_space<vmem>>, %arg4: memref<8x16xf32, #tpu.memory_space<vmem>>) attributes {dimension_semantics = [#tpu.dimension_semantics<parallel>], iteration_bounds = array<i64: 1>, scalar_prefetch = 0 : i64, scratch_operands = 0 : i64, tpu.core_type = #tpu.core_type<tc>, window_params = [{transform_indices = @transform_0, window_bounds = array<i64: 2>}, {transform_indices = @transform_1, window_bounds = array<i64: 2, 8, 32>}, {pipeline_mode = #tpu.pipeline_mode<synchronous>, transform_indices = @transform_2, window_bounds = array<i64: 2, 32, 16>}, {transform_indices = @transform_3, window_bounds = array<i64: 8, 16>}]} {
    %c0 = arith.constant 0 : index
    %c0_0 = arith.constant 0 : index
    %c0_1 = arith.constant 0 : index
    %0 = vector.load %arg2[%c0, %c0_0, %c0_1] : memref<2x8x32xbf16, #tpu.memory_space<vmem>>, vector<1x8x32xbf16>
    %1 = vector.shape_cast %0 : vector<1x8x32xbf16> to vector<8x32xbf16>
    %c0_2 = arith.constant 0 : index
    %c0_3 = arith.constant 0 : index
    %c0_4 = arith.constant 0 : index
    %2 = vector.load %arg3[%c0_2, %c0_3, %c0_4] : memref<2x32x16xbf16, #tpu.memory_space<vmem>>, vector<1x32x16xbf16>
    %3 = vector.shape_cast %2 : vector<1x32x16xbf16> to vector<32x16xbf16>
    %cst = arith.constant dense<0.000000e+00> : vector<8x16xf32>
    %4 = tpu.matmul %1, %3, %cst {dimension_numbers = #tpu.dot_dimension_numbers<[1], [0], [0], [1], [0, 0, 1, 1], [], []>} : vector<8x32xbf16>, vector<32x16xbf16>, vector<8x16xf32> -> vector<8x16xf32>
    %cst_5 = arith.constant dense<0xFF800000> : vector<8xf32>
    %5 = vector.multi_reduction <maximumf>, %4, %cst_5 [1] : vector<8x16xf32> to vector<8xf32>
    %6 = vector.shape_cast %5 : vector<8xf32> to vector<8x1xf32>
    %7 = vector.broadcast %6 : vector<8x1xf32> to vector<8x16xf32>
    %8 = arith.subf %4, %7 : vector<8x16xf32>
    %9 = math.exp %8 : vector<8x16xf32>
    %cst_6 = arith.constant dense<0.000000e+00> : vector<8xf32>
    %10 = vector.multi_reduction <add>, %9, %cst_6 [1] : vector<8x16xf32> to vector<8xf32>
    %11 = vector.shape_cast %10 : vector<8xf32> to vector<8x1xf32>
    %12 = tpu.reciprocal %11 {approx = true} : vector<8x1xf32> -> vector<8x1xf32>
    %13 = arith.mulf %11, %12 : vector<8x1xf32>
    %cst_7 = arith.constant 2.000000e+00 : f32
    %14 = vector.broadcast %cst_7 : f32 to vector<8x1xf32>
    %15 = arith.subf %14, %13 : vector<8x1xf32>
    %16 = arith.mulf %12, %15 : vector<8x1xf32>
    %17 = vector.broadcast %16 : vector<8x1xf32> to vector<8x16xf32>
    %18 = arith.mulf %9, %17 : vector<8x16xf32>
    %c0_8 = arith.constant 0 : index
    %19 = memref.load %arg1[%c0_8] : memref<2xf32, #tpu.memory_space<smem>>
    %20 = vector.broadcast %19 : f32 to vector<8x16xf32>
    %21 = arith.mulf %20, %18 : vector<8x16xf32>
    %c1 = arith.constant 1 : index
    %c0_9 = arith.constant 0 : index
    %c0_10 = arith.constant 0 : index
    %22 = vector.load %arg2[%c1, %c0_9, %c0_10] : memref<2x8x32xbf16, #tpu.memory_space<vmem>>, vector<1x8x32xbf16>
    %23 = vector.shape_cast %22 : vector<1x8x32xbf16> to vector<8x32xbf16>
    %c1_11 = arith.constant 1 : index
    %c0_12 = arith.constant 0 : index
    %c0_13 = arith.constant 0 : index
    %24 = vector.load %arg3[%c1_11, %c0_12, %c0_13] : memref<2x32x16xbf16, #tpu.memory_space<vmem>>, vector<1x32x16xbf16>
    %25 = vector.shape_cast %24 : vector<1x32x16xbf16> to vector<32x16xbf16>
    %cst_14 = arith.constant dense<0.000000e+00> : vector<8x16xf32>
    %26 = tpu.matmul %23, %25, %cst_14 {dimension_numbers = #tpu.dot_dimension_numbers<[1], [0], [0], [1], [0, 0, 1, 1], [], []>} : vector<8x32xbf16>, vector<32x16xbf16>, vector<8x16xf32> -> vector<8x16xf32>
    %cst_15 = arith.constant dense<0xFF800000> : vector<8xf32>
    %27 = vector.multi_reduction <maximumf>, %26, %cst_15 [1] : vector<8x16xf32> to vector<8xf32>
    %28 = vector.shape_cast %27 : vector<8xf32> to vector<8x1xf32>
    %29 = vector.broadcast %28 : vector<8x1xf32> to vector<8x16xf32>
    %30 = arith.subf %26, %29 : vector<8x16xf32>
    %31 = math.exp %30 : vector<8x16xf32>
    %cst_16 = arith.constant dense<0.000000e+00> : vector<8xf32>
    %32 = vector.multi_reduction <add>, %31, %cst_16 [1] : vector<8x16xf32> to vector<8xf32>
    %33 = vector.shape_cast %32 : vector<8xf32> to vector<8x1xf32>
    %34 = tpu.reciprocal %33 {approx = true} : vector<8x1xf32> -> vector<8x1xf32>
    %35 = arith.mulf %33, %34 : vector<8x1xf32>
    %cst_17 = arith.constant 2.000000e+00 : f32
    %36 = vector.broadcast %cst_17 : f32 to vector<8x1xf32>
    %37 = arith.subf %36, %35 : vector<8x1xf32>
    %38 = arith.mulf %34, %37 : vector<8x1xf32>
    %39 = vector.broadcast %38 : vector<8x1xf32> to vector<8x16xf32>
    %40 = arith.mulf %31, %39 : vector<8x16xf32>
    %c1_18 = arith.constant 1 : index
    %41 = memref.load %arg1[%c1_18] : memref<2xf32, #tpu.memory_space<smem>>
    %42 = vector.broadcast %41 : f32 to vector<8x16xf32>
    %43 = arith.mulf %42, %40 : vector<8x16xf32>
    %44 = arith.addf %21, %43 : vector<8x16xf32>
    %cst_19 = arith.constant dense<0xFF800000> : vector<8xf32>
    %45 = vector.multi_reduction <maximumf>, %44, %cst_19 [1] : vector<8x16xf32> to vector<8xf32>
    %46 = vector.shape_cast %45 : vector<8xf32> to vector<8x1xf32>
    %47 = vector.broadcast %46 : vector<8x1xf32> to vector<8x16xf32>
    %48 = arith.subf %44, %47 : vector<8x16xf32>
    %49 = math.exp %48 : vector<8x16xf32>
    %cst_20 = arith.constant dense<0.000000e+00> : vector<8xf32>
    %50 = vector.multi_reduction <add>, %49, %cst_20 [1] : vector<8x16xf32> to vector<8xf32>
    %51 = vector.shape_cast %50 : vector<8xf32> to vector<8x1xf32>
    %52 = tpu.reciprocal %51 {approx = true} : vector<8x1xf32> -> vector<8x1xf32>
    %53 = arith.mulf %51, %52 : vector<8x1xf32>
    %cst_21 = arith.constant 2.000000e+00 : f32
    %54 = vector.broadcast %cst_21 : f32 to vector<8x1xf32>
    %55 = arith.subf %54, %53 : vector<8x1xf32>
    %56 = arith.mulf %52, %55 : vector<8x1xf32>
    %57 = vector.broadcast %56 : vector<8x1xf32> to vector<8x16xf32>
    %58 = arith.mulf %49, %57 : vector<8x16xf32>
    %c0_22 = arith.constant 0 : index
    %c0_23 = arith.constant 0 : index
    %59 = vector.load %arg4[%c0_22, %c0_23] : memref<8x16xf32, #tpu.memory_space<vmem>>, vector<8x16xf32>
    tpu.vector_store %arg4[%c0_22, %c0_23], %58 {strides = array<i32>} : memref<8x16xf32, #tpu.memory_space<vmem>>, vector<8x16xf32>,
    return
  }
  func.func @transform_0(%arg0: i32) -> i32 {
    %c0_i32 = arith.constant 0 : i32
    %c0_i32_0 = arith.constant 0 : i32
    return %c0_i32 : i32
  }
  func.func @transform_1(%arg0: i32) -> (i32, i32, i32) {
    %c0_i32 = arith.constant 0 : i32
    %c0_i32_0 = arith.constant 0 : i32
    %c0_i32_1 = arith.constant 0 : i32
    return %c0_i32, %arg0, %c0_i32_0 : i32, i32, i32
  }
  func.func @transform_2(%arg0: i32) -> (i32, i32, i32) {
    %c0_i32 = arith.constant 0 : i32
    %c0_i32_0 = arith.constant 0 : i32
    %c0_i32_1 = arith.constant 0 : i32
    %c0_i32_2 = arith.constant 0 : i32
    return %c0_i32, %c0_i32_0, %c0_i32_1 : i32, i32, i32
  }
  func.func @transform_3(%arg0: i32) -> (i32, i32) {
    %c0_i32 = arith.constant 0 : i32
    %c0_i32_0 = arith.constant 0 : i32
    return %arg0, %c0_i32 : i32, i32
  }
}

</mosaic_0001>

<bundles_post_ra>
// kernel: tpu_custom_call.1
= control target key start
LH: loop header
LB: loop body
LE: loop exit
PB: predicated region body
PF: predicated region fallthrough
CT: control target
= control target key end

     0   :  { %8 = vsyncpa [#allocation4], 0  ;;  %s374_s0 = inlined_call_operand.vmem [shape: f32[2], index: 0, kind: input, shape index: {}]   ;;  %s375_s1 = inlined_call_operand.vmem [shape: bf16[2,8,32], index: 1, kind: input, shape index: {}]   ;;  %s376_s2 = inlined_call_operand.vmem [shape: bf16[2,32,16], index: 2, kind: input, shape index: {}]   ;;  %s377_s3 = inlined_call_operand.hbm [shape: f32[8,16], index: 3, kind: output, shape index: {}]  }
   0x1   :  { %9 = vsyncpa [#allocation3], 0  ;;  %s16_s14 = sshll.u32 %s374_s0, 4  ;;  %s17_s14 = int_to_ptr.vmem [resolvable:$true] %s16_s14 }
   0x2   :  { %s272_s15 = scalar_lea.vmem %s17_s14, 16  ;;  %p277_p1 = scmp.lt.s32.totalorder %s17_s14, %s17_s14 }
   0x3   :  { %p273_p0 = scmp.ne.s32.totalorder %s17_s14, %s272_s15  ;;  %p278_p2 = scmp.lt.s32.totalorder %s272_s15, %s272_s15 }
   0x5   :  { %p279_p3 = por %p278_p2, %p277_p1 }
   0x7   :  { %p280_p4 = pnand %p279_p3, %p273_p0 }
   0x9   :  { %283 = shalt.err (!%p280_p4)
}
   0xa   :  { %s310_s16 = smov [#allocation2]  }
   0xb   :  { %19 = dma.vmem_to_smem %s17_s14, 16, %s310_s16, [#allocation4]  }
   0xc   :  { %306 = dma.done.wait [#allocation4], 16  }
   0xd   :  { %307 = vsyncadd [#allocation4], 4294967280 }
   0xe   :  { %27 = sfence }
   0xf   :  { %v256_v0 = vld [vmem:[%s376_s2] sm:$0xff]   ;;  %v311_v1 = vmov 0.0   ;;  %v257_v2 = vld [vmem:[%s376_s2 + $0x10] sm:$0xff]   ;;  %v258_v3 = vld [vmem:[%s376_s2 + $0x8] sm:$0xff]   ;;  %vm312_vm0 = vmmov 0   ;;  %vm46_vm1 = vcmask 261120  }
  0x10   :  { %236 = vmatprep.subr.bf16.mxu0 %v311_v1  ;;  %244 = vmatprep.subr.bf16.mxu1 %v311_v1  ;;  %v259_v4 = vld [vmem:[%s376_s2 + $0x18] sm:$0xff]   ;;  %v29_v5 = vld [vmem:[%s375_s1] sm:$0xf]  ;;  %v221_v6 = vld [vmem:[%s375_s1 + $0x4] sm:$0xf]  ;;  %vm90_vm2 = vcmask 130048  }
  0x11   :  { %237 = vmatpush3.bf16.msra.mxu0 %v256_v0  ;;  %240 = vmatprep.mubr.msk.bf16.mxu0 %vm312_vm0, %v311_v1  ;;  %s105_s1 = sld [smem:[#allocation2]]  ;;  %s229_s2 = sld [smem:[#allocation2 + $0x1]] }
  0x12   :  { %245 = vmatpush3.bf16.msra.mxu1 %v257_v2  ;;  %238 = vmatprep.subr.bf16.mxu0 %v311_v1  ;;  %s313_s28 = smov [#allocation5]  }
  0x13   :  { %246 = vmatprep.subr.bf16.mxu1 %v311_v1  ;;  %248 = vmatprep.mubr.msk.bf16.mxu1 %vm312_vm0, %v311_v1  ;;  %s209_s29 = sshll.u32 %s313_s28, 4  ;;  %s210_s29 = int_to_ptr.vmem [resolvable:$true] %s209_s29 }
  0x14   :  { %s284_s30 = scalar_lea.vmem %s210_s29, 128  ;;  %p289_p6 = scmp.lt.s32.totalorder %s210_s29, %s210_s29 }
  0x15   :  { %239 = vmatpush3.bf16.msra.mxu0 %v258_v3  ;;  %p285_p5 = scmp.ne.s32.totalorder %s210_s29, %s284_s30  ;;  %p290_p7 = scmp.lt.s32.totalorder %s284_s30, %s284_s30 }
  0x16   :  { %247 = vmatpush3.bf16.msra.mxu1 %v259_v4 }
  0x17   :  { %v106_v38 = vstv %s105_s1  ;;  %v185_v39 = vstv %s229_s2  ;;  %p291_p8 = por %p290_p7, %p289_p6 }
  0x18   :  { %241 = vmatmul.mubr.msk.bf16.vlgmr.msra.gmra.mrb[0].mxu0 %vm46_vm1, %v29_v5 }
  0x19   :  { %249 = vmatmul.mubr.msk.bf16.vlgmr.msra.gmra.mrb[0].mxu1 %vm46_vm1, %v221_v6  ;;  %p292_p9 = pnand %p291_p8, %p285_p5 }
  0xeb   :  { %v84_v7 = vpop.f32.mrb[0].mxu0 }
  0xec   :  { %v242_v8 = vpop.f32.mrb[1].mxu0  ;;  %v164_v9 = vpop.f32.mrb[0].mxu1  ;;  %v91_v10 = vsel %vm90_vm2, %v84_v7, -inf }
  0xed   :  { %v250_v11 = vpop.f32.mrb[1].mxu1  ;;  %92 = vmax.xlane.f32.xlu0 %v91_v10  ;;  %v87_v12 = vpop.f32.mrb[2].mxu0  ;;  %v170_v15 = vsel %vm90_vm2, %v164_v9, -inf }
  0xee   :  { %v243_v13 = vpop.f32.mrb[3].mxu0  ;;  %v167_v14 = vpop.f32.mrb[2].mxu1 }
  0xef   :  { %v251_v16 = vpop.f32.mrb[3].mxu1 }
  0xf1   :  { %171 = vmax.xlane.f32.xlu0 %v170_v15 }
 0x17a   :  { %v93_v17 = vpop.xlane.xlu0 %92 }
 0x17b   :  { %v94_v18 = vsub.f32 %v84_v7, %v93_v17 }
 0x17d   :  { %v95_v19 = vmul.f32 1.442695, %v94_v18 }
 0x17e   :  { %v172_v20 = vpop.xlane.xlu0 %171 }
 0x17f   :  { %260 = vpow2.f32 %v95_v19  ;;  %v173_v21 = vsub.f32 %v164_v9, %v172_v20 }
 0x181   :  { %v174_v22 = vmul.f32 1.442695, %v173_v21 }
 0x183   :  { %262 = vpow2.f32 %v174_v22 }
 0x189   :  { %v261_v23 = vpop.eup %260 }
 0x18a   :  { %v97_v24 = vsel %vm90_vm2, %v261_v23, 0.0 }
 0x18b   :  { %98 = vadd.xlane.f32.xlu1 %v97_v24 }
 0x18d   :  { %v263_v25 = vpop.eup %262 }
 0x18e   :  { %v176_v26 = vsel %vm90_vm2, %v263_v25, 0.0 }
 0x18f   :  { %177 = vadd.xlane.f32.xlu1 %v176_v26 }
 0x218   :  { %v99_v27 = vpop.xlane.xlu1 %98 }
 0x219   :  { %264 = vrcp.f32 %v99_v27 }
 0x21c   :  { %v178_v28 = vpop.xlane.xlu1 %177 }
 0x21d   :  { %266 = vrcp.f32 %v178_v28 }
 0x223   :  { %v265_v29 = vpop.eup %264 }
 0x224   :  { %v101_v30 = vmul.f32 %v265_v29, %v99_v27 }
 0x226   :  { %v102_v31 = vsub.f32 2.0, %v101_v30 }
 0x227   :  { %v267_v32 = vpop.eup %266 }
 0x228   :  { %v103_v33 = vmul.f32 %v265_v29, %v102_v31  ;;  %v180_v34 = vmul.f32 %v267_v32, %v178_v28 }
 0x22a   :  { %v181_v35 = vsub.f32 2.0, %v180_v34  ;;  %v104_v36 = vmul.f32 %v261_v23, %v103_v33 }
 0x22c   :  { %v182_v37 = vmul.f32 %v267_v32, %v181_v35  ;;  %v107_v41 = vmul.f32 %v106_v38, %v104_v36 }
 0x22e   :  { %v183_v40 = vmul.f32 %v263_v25, %v182_v37 }
 0x230   :  { %v186_v42 = vmul.f32 %v185_v39, %v183_v40 }
 0x232   :  { %v187_v43 = vadd.f32 %v186_v42, %v107_v41 }
 0x234   :  { %v188_v44 = vsel %vm90_vm2, %v187_v43, -inf }
 0x235   :  { %189 = vmax.xlane.f32.xlu0 %v188_v44 }
 0x2c2   :  { %v190_v45 = vpop.xlane.xlu0 %189 }
 0x2c3   :  { %v191_v46 = vsub.f32 %v187_v43, %v190_v45 }
 0x2c5   :  { %v192_v47 = vmul.f32 1.442695, %v191_v46 }
 0x2c7   :  { %268 = vpow2.f32 %v192_v47 }
 0x2d1   :  { %v269_v48 = vpop.eup %268 }
 0x2d2   :  { %v194_v49 = vsel %vm90_vm2, %v269_v48, 0.0 }
 0x2d3   :  { %195 = vadd.xlane.f32.xlu1 %v194_v49 }
 0x360   :  { %v196_v50 = vpop.xlane.xlu1 %195 }
 0x361   :  { %270 = vrcp.f32 %v196_v50 }
 0x36b   :  { %v271_v51 = vpop.eup %270 }
 0x36c   :  { %v198_v52 = vmul.f32 %v271_v51, %v196_v50 }
 0x36e   :  { %v199_v53 = vsub.f32 2.0, %v198_v52 }
 0x370   :  { %v200_v54 = vmul.f32 %v271_v51, %v199_v53 }
 0x372   :  { %v201_v55 = vmul.f32 %v269_v48, %v200_v54 }
 0x374   :  { %202 = vst.msk [vmem:[#allocation5] sm:$0xff] %vm90_vm2, %v201_v55 }
 0x375   :  { %295 = shalt.err (!%p292_p9)
}
 0x376   :  { %s296_s6 = scalar_lea.hbm %s377_s3, 128 }
 0x377   :  { %p297_p10 = scmp.ne.s32.totalorder %s377_s3, %s296_s6  ;;  %p300_p11 = scmp.lt.u32.totalorder %s296_s6, %s377_s3 }
 0x379   :  { %p302_p12 = pnand %p300_p11, %p297_p10 }
 0x37b   :  { %305 = shalt.err (!%p302_p12)
}
 0x37c   :  { %212 = dma.vmem_to_hbm [thread:$0]  %s210_s29, 128, %s377_s3, [#allocation3]  }
 0x37d   :  { %308 = dma.done.wait [#allocation3], 128  }
 0x37e   :  { %309 = vsyncadd [#allocation3], 4294967168 }
 0x37f   :  { %216 = vsyncpa [#allocation3], 1 }
 0x380   :  { %217 = vsyncpa [#allocation4], 1 }

</bundles_post_ra>
